<compile_context>
chip_gen: v7x
topology: tpu7x:2x2x1
jax: 0.10.0
libtpu: 0.0.40
codegen_flags: <defaults>
</compile_context>

<pallas_src>
import jax
import jax.numpy as jnp
from jax.experimental import pallas as pl
from jax.experimental.pallas import tpu as pltpu

EPS = 1e-6
LANE = 128


def _round_up(x, m):
    return (x + m - 1) // m * m


def _row_tiling(n_rows):
    """Row-tile size (multiple of 8 sublanes) and padded row count."""
    if n_rows <= 256:
        tn = _round_up(max(n_rows, 8), 8)
        return tn, tn
    tn = 256
    return tn, _round_up(n_rows, tn)


# ---------------------------------------------------------------------------
# Fused kernel: all layers + final norm + output projection in one pallas_call
# ---------------------------------------------------------------------------
def mlp_forward_fused(x_rows, w1s, w3s, w2s, wo, *, d_true, tn):
    """
    x_rows: (N_pad, Dp)  f32   embedded tokens, rows/lanes zero-padded
    w1s,w3s:(L, Dp, Fp)  bf16  stacked, pre-transposed (x @ W), zero-padded
    w2s:    (L, Fp, Dp)  bf16
    wo:     (Dp, Op)     bf16
    returns (N_pad, Op)  f32
    """
    n_pad, dp = x_rows.shape
    nlayers, _, fp = w1s.shape
    op = wo.shape[1]
    assert n_pad % tn == 0
    r = n_pad // tn
    inv_d = 1.0 / float(d_true)

    def rms_norm(x):
        # padded lanes are guaranteed zero -> sum over Dp == sum over true D
        ms = jnp.sum(x * x, axis=-1, keepdims=True) * inv_d
        return x * jax.lax.rsqrt(ms + EPS)

    def kernel(x_ref, w1_ref, w3_ref, w2_ref, wo_ref, o_ref, acc_ref):
        l = pl.program_id(1)

        @pl.when(l == 0)
        def _():
            acc_ref[...] = x_ref[...]          # load embeddings for this row tile

        x = acc_ref[...]                        # (tn, Dp) f32, carried across layers
        xn = rms_norm(x).astype(jnp.bfloat16)
        h1 = jnp.dot(xn, w1_ref[0], preferred_element_type=jnp.float32)   # (tn, Fp)
        h3 = jnp.dot(xn, w3_ref[0], preferred_element_type=jnp.float32)   # (tn, Fp)
        h = (h1 * jax.nn.sigmoid(h1)) * h3                                # SiLU gate, f32
        y = jnp.dot(h.astype(jnp.bfloat16), w2_ref[0],
                    preferred_element_type=jnp.float32)                   # (tn, Dp)
        x_new = y + x                                                     # residual
        acc_ref[...] = x_new

        @pl.when(l == pl.num_programs(1) - 1)
        def _():
            xo = rms_norm(x_new).astype(jnp.bfloat16)
            o_ref[...] = jnp.dot(xo, wo_ref[...],
                                 preferred_element_type=jnp.float32)      # (tn, Op)

    flops = (r * nlayers * tn * (3 * 2 * dp * fp)) + (n_pad * 2 * dp * op)
    transcendentals = n_pad * fp * nlayers + n_pad * (nlayers + 1)
    bytes_accessed = (x_rows.size * 4 + (w1s.size + w3s.size + w2s.size + wo.size) * 2
                      + n_pad * op * 4)

    grid_spec = pltpu.PrefetchScalarGridSpec(
        num_scalar_prefetch=0,
        grid=(r, nlayers),
        in_specs=[
            pl.BlockSpec((tn, dp), lambda i, l: (i, 0)),       # activations: per row tile
            pl.BlockSpec((1, dp, fp), lambda i, l: (l, 0, 0)),  # w1[l]
            pl.BlockSpec((1, dp, fp), lambda i, l: (l, 0, 0)),  # w3[l]
            pl.BlockSpec((1, fp, dp), lambda i, l: (l, 0, 0)),  # w2[l]
            pl.BlockSpec((dp, op), lambda i, l: (0, 0)),        # wo: VMEM-resident
        ],
        out_specs=pl.BlockSpec((tn, op), lambda i, l: (i, 0)),
        scratch_shapes=[pltpu.VMEM((tn, dp), jnp.float32)],     # activation carry
    )

    return pl.pallas_call(
        kernel,
        out_shape=jax.ShapeDtypeStruct((n_pad, op), jnp.float32),
        grid_spec=grid_spec,
        compiler_params=pltpu.CompilerParams(
            dimension_semantics=("parallel", "arbitrary")),
        cost_estimate=pl.CostEstimate(flops=flops,
                                      transcendentals=transcendentals,
                                      bytes_accessed=bytes_accessed),
    )(x_rows, w1s, w3s, w2s, wo)


# ---------------------------------------------------------------------------
# Parameters: raw f32 (reference) + padded/stacked bf16 (kernel)
# ---------------------------------------------------------------------------
def init_params(key, input_size, output_size, emb_dim, ffn_dim, nb_layers):
    keys = jax.random.split(key, 2 + 3 * nb_layers)
    params = {
        "emb": jax.random.normal(keys[0], (input_size, emb_dim), jnp.float32) * 0.02,
        "out": jax.random.normal(keys[1], (emb_dim, output_size), jnp.float32) * 0.02,
        "layers": [],
    }
    for l in range(nb_layers):
        k1, k2, k3 = keys[2 + 3 * l: 5 + 3 * l]
        params["layers"].append({
            "w1": jax.random.normal(k1, (emb_dim, ffn_dim), jnp.float32) * 0.02,
            "w2": jax.random.normal(k2, (ffn_dim, emb_dim), jnp.float32) * 0.02,
            "w3": jax.random.normal(k3, (emb_dim, ffn_dim), jnp.float32) * 0.02,
        })
    return params


def prepare_kernel_params(params):
    emb = params["emb"]
    d = emb.shape[1]
    f = params["layers"][0]["w1"].shape[1]
    o = params["out"].shape[1]
    dp, fp, op = _round_up(d, LANE), _round_up(f, LANE), _round_up(o, LANE)

    def pad2(w, rows, cols):
        return jnp.pad(w, ((0, rows - w.shape[0]), (0, cols - w.shape[1])))

    w1s = jnp.stack([pad2(lp["w1"], dp, fp) for lp in params["layers"]]).astype(jnp.bfloat16)
    w3s = jnp.stack([pad2(lp["w3"], dp, fp) for lp in params["layers"]]).astype(jnp.bfloat16)
    w2s = jnp.stack([pad2(lp["w2"], fp, dp) for lp in params["layers"]]).astype(jnp.bfloat16)
    wo = pad2(params["out"], dp, op).astype(jnp.bfloat16)
    return {"emb": emb, "w1s": w1s, "w3s": w3s, "w2s": w2s, "wo": wo,
            "dims": (d, f, o, dp, fp, op)}


def model_forward(kparams, tokens):
    b, s = tokens.shape
    d, f, o, dp, fp, op = kparams["dims"]
    n = b * s
    tn, n_pad = _row_tiling(n)

    x = jnp.take(kparams["emb"], tokens.reshape(-1), axis=0)        # (N, D) gather in JAX
    x = jnp.pad(x, ((0, n_pad - n), (0, dp - d)))                    # lane/row zero-pad
    out = mlp_forward_fused(x, kparams["w1s"], kparams["w3s"],
                            kparams["w2s"], kparams["wo"], d_true=d, tn=tn)
    return out[:n, :o].reshape(b, s, o)


# ---------------------------------------------------------------------------
# Pure-JAX references
# ---------------------------------------------------------------------------
def _rmsnorm(x):
    return x * jax.lax.rsqrt(jnp.mean(x * x, axis=-1, keepdims=True) + EPS)


def model_forward_ref_f32(params, tokens):
    b, s = tokens.shape
    out = jnp.take(params["emb"], tokens.reshape(-1), axis=0)
    for lp in params["layers"]:
        xn = _rmsnorm(out)
        h = jax.nn.silu(xn @ lp["w1"]) * (xn @ lp["w3"])
        out = h @ lp["w2"] + out
    return (_rmsnorm(out) @ params["out"]).reshape(b, s, -1)


def model_forward_ref_bf16(params, tokens):
    """Matches the kernel's mixed precision (bf16 dot inputs, f32 accumulation)."""
    b, s = tokens.shape
    bf = jnp.bfloat16
    out = jnp.take(params["emb"], tokens.reshape(-1), axis=0)
    for lp in params["layers"]:
        xn = _rmsnorm(out).astype(bf)
        h1 = jnp.dot(xn, lp["w1"].astype(bf), preferred_element_type=jnp.float32)
        h3 = jnp.dot(xn, lp["w3"].astype(bf), preferred_element_type=jnp.float32)
        h = ((h1 * jax.nn.sigmoid(h1)) * h3).astype(bf)
        out = jnp.dot(h, lp["w2"].astype(bf), preferred_element_type=jnp.float32) + out
    xo = _rmsnorm(out).astype(bf)
    logits = jnp.dot(xo, params["out"].astype(bf), preferred_element_type=jnp.float32)
    return logits.reshape(b, s, -1)


if __name__ == "__main__":
    # small config consistent with the module
    input_size, output_size = 32, 16
    emb_dim, ffn_dim, nb_layers = 32, 64, 2
    batch, seq = 2, 8

    key = jax.random.PRNGKey(0)
    pkey, tkey = jax.random.split(key)
    params = init_params(pkey, input_size, output_size, emb_dim, ffn_dim, nb_layers)
    kparams = prepare_kernel_params(params)
    tokens = jax.random.randint(tkey, (batch, seq), 0, input_size, dtype=jnp.int32)

    out = model_forward(kparams, tokens)
    out = jax.block_until_ready(out)
    assert out.shape == (batch, seq, output_size)

    # tight check against a precision-matched reference
    ref_bf16 = model_forward_ref_bf16(params, tokens)
    assert jnp.allclose(out, ref_bf16, atol=1e-3, rtol=1e-3), (
        "mismatch vs bf16-matched reference: %e"
        % float(jnp.max(jnp.abs(out - ref_bf16))))

    # loose check against the full-f32 PyTorch-equivalent reference
    ref_f32 = model_forward_ref_f32(params, tokens)
    assert jnp.allclose(out, ref_f32, atol=1e-2, rtol=1e-2), (
        "mismatch vs f32 reference: %e"
        % float(jnp.max(jnp.abs(out - ref_f32))))

    print("KERNEL_OK")
</pallas_src>

<mosaic_0001>
module attributes {stable_mosaic.version = 11 : i64} {
  func.func @kernel(%arg0: i32, %arg1: i32, %arg2: memref<16x128xf32, #tpu.memory_space<vmem>>, %arg3: memref<1x128x128xbf16, #tpu.memory_space<vmem>>, %arg4: memref<1x128x128xbf16, #tpu.memory_space<vmem>>, %arg5: memref<1x128x128xbf16, #tpu.memory_space<vmem>>, %arg6: memref<128x128xbf16, #tpu.memory_space<vmem>>, %arg7: memref<16x128xf32, #tpu.memory_space<vmem>>, %arg8: memref<16x128xf32, #tpu.memory_space<vmem>>) attributes {dimension_semantics = [#tpu.dimension_semantics<parallel>, #tpu.dimension_semantics<arbitrary>], iteration_bounds = array<i64: 1, 2>, scalar_prefetch = 0 : i64, scratch_operands = 1 : i64, tpu.core_type = #tpu.core_type<tc>, window_params = [{transform_indices = @transform_0, window_bounds = array<i64: 16, 128>}, {transform_indices = @transform_1, window_bounds = array<i64: 1, 128, 128>}, {transform_indices = @transform_2, window_bounds = array<i64: 1, 128, 128>}, {transform_indices = @transform_3, window_bounds = array<i64: 1, 128, 128>}, {pipeline_mode = #tpu.pipeline_mode<synchronous>, transform_indices = @transform_4, window_bounds = array<i64: 128, 128>}, {transform_indices = @transform_5, window_bounds = array<i64: 16, 128>}]} {
    %c0_i32 = arith.constant 0 : i32
    %0 = arith.cmpi eq, %arg1, %c0_i32 : i32
    %1 = arith.extui %0 : i1 to i32
    %c0_i32_0 = arith.constant 0 : i32
    %2 = arith.cmpi ne, %1, %c0_i32_0 : i32
    scf.if %2 {
      %c0_20 = arith.constant 0 : index
      %c0_21 = arith.constant 0 : index
      %37 = vector.load %arg2[%c0_20, %c0_21] : memref<16x128xf32, #tpu.memory_space<vmem>>, vector<16x128xf32>
      %c0_22 = arith.constant 0 : index
      %c0_23 = arith.constant 0 : index
      %38 = vector.load %arg8[%c0_22, %c0_23] : memref<16x128xf32, #tpu.memory_space<vmem>>, vector<16x128xf32>
      tpu.vector_store %arg8[%c0_22, %c0_23], %37 {strides = array<i32>} : memref<16x128xf32, #tpu.memory_space<vmem>>, vector<16x128xf32>,
    } else {
    }
    %c0 = arith.constant 0 : index
    %c0_1 = arith.constant 0 : index
    %3 = vector.load %arg8[%c0, %c0_1] : memref<16x128xf32, #tpu.memory_space<vmem>>, vector<16x128xf32>
    %4 = arith.mulf %3, %3 : vector<16x128xf32>
    %cst = arith.constant dense<0.000000e+00> : vector<16xf32>
    %5 = vector.multi_reduction <add>, %4, %cst [1] : vector<16x128xf32> to vector<16xf32>
    %6 = vector.shape_cast %5 : vector<16xf32> to vector<16x1xf32>
    %cst_2 = arith.constant 3.125000e-02 : f32
    %7 = vector.broadcast %cst_2 : f32 to vector<16x1xf32>
    %8 = arith.mulf %6, %7 : vector<16x1xf32>
    %cst_3 = arith.constant 9.99999997E-7 : f32
    %9 = vector.broadcast %cst_3 : f32 to vector<16x1xf32>
    %10 = arith.addf %8, %9 : vector<16x1xf32>
    %11 = math.rsqrt %10 : vector<16x1xf32>
    %12 = vector.broadcast %11 : vector<16x1xf32> to vector<16x128xf32>
    %13 = arith.mulf %3, %12 : vector<16x128xf32>
    %14 = arith.truncf %13 : vector<16x128xf32> to vector<16x128xbf16>
    %c0_4 = arith.constant 0 : index
    %c0_5 = arith.constant 0 : index
    %c0_6 = arith.constant 0 : index
    %15 = vector.load %arg3[%c0_4, %c0_5, %c0_6] : memref<1x128x128xbf16, #tpu.memory_space<vmem>>, vector<1x128x128xbf16>
    %16 = vector.shape_cast %15 : vector<1x128x128xbf16> to vector<128x128xbf16>
    %cst_7 = arith.constant dense<0.000000e+00> : vector<16x128xf32>
    %17 = tpu.matmul %14, %16, %cst_7 {dimension_numbers = #tpu.dot_dimension_numbers<[1], [0], [0], [1], [0, 0, 1, 1], [], []>} : vector<16x128xbf16>, vector<128x128xbf16>, vector<16x128xf32> -> vector<16x128xf32>
    %c0_8 = arith.constant 0 : index
    %c0_9 = arith.constant 0 : index
    %c0_10 = arith.constant 0 : index
    %18 = vector.load %arg4[%c0_8, %c0_9, %c0_10] : memref<1x128x128xbf16, #tpu.memory_space<vmem>>, vector<1x128x128xbf16>
    %19 = vector.shape_cast %18 : vector<1x128x128xbf16> to vector<128x128xbf16>
    %cst_11 = arith.constant dense<0.000000e+00> : vector<16x128xf32>
    %20 = tpu.matmul %14, %19, %cst_11 {dimension_numbers = #tpu.dot_dimension_numbers<[1], [0], [0], [1], [0, 0, 1, 1], [], []>} : vector<16x128xbf16>, vector<128x128xbf16>, vector<16x128xf32> -> vector<16x128xf32>
    %21 = arith.negf %17 : vector<16x128xf32>
    %22 = math.exp %21 : vector<16x128xf32>
    %cst_12 = arith.constant 1.000000e+00 : f32
    %23 = vector.broadcast %cst_12 : f32 to vector<16x128xf32>
    %24 = arith.addf %23, %22 : vector<16x128xf32>
    %25 = arith.divf %23, %24 : vector<16x128xf32>
    %26 = arith.mulf %17, %25 : vector<16x128xf32>
    %27 = arith.mulf %26, %20 : vector<16x128xf32>
    %28 = arith.truncf %27 : vector<16x128xf32> to vector<16x128xbf16>
    %c0_13 = arith.constant 0 : index
    %c0_14 = arith.constant 0 : index
    %c0_15 = arith.constant 0 : index
    %29 = vector.load %arg5[%c0_13, %c0_14, %c0_15] : memref<1x128x128xbf16, #tpu.memory_space<vmem>>, vector<1x128x128xbf16>
    %30 = vector.shape_cast %29 : vector<1x128x128xbf16> to vector<128x128xbf16>
    %cst_16 = arith.constant dense<0.000000e+00> : vector<16x128xf32>
    %31 = tpu.matmul %28, %30, %cst_16 {dimension_numbers = #tpu.dot_dimension_numbers<[1], [0], [0], [1], [0, 0, 1, 1], [], []>} : vector<16x128xbf16>, vector<128x128xbf16>, vector<16x128xf32> -> vector<16x128xf32>
    %32 = arith.addf %31, %3 : vector<16x128xf32>
    %c0_17 = arith.constant 0 : index
    %c0_18 = arith.constant 0 : index
    %33 = vector.load %arg8[%c0_17, %c0_18] : memref<16x128xf32, #tpu.memory_space<vmem>>, vector<16x128xf32>
    tpu.vector_store %arg8[%c0_17, %c0_18], %32 {strides = array<i32>} : memref<16x128xf32, #tpu.memory_space<vmem>>, vector<16x128xf32>,
    %c1_i32 = arith.constant 1 : i32
    %34 = arith.cmpi eq, %arg1, %c1_i32 : i32
    %35 = arith.extui %34 : i1 to i32
    %c0_i32_19 = arith.constant 0 : i32
    %36 = arith.cmpi ne, %35, %c0_i32_19 : i32
    scf.if %36 {
      %37 = arith.mulf %32, %32 : vector<16x128xf32>
      %cst_20 = arith.constant dense<0.000000e+00> : vector<16xf32>
      %38 = vector.multi_reduction <add>, %37, %cst_20 [1] : vector<16x128xf32> to vector<16xf32>
      %39 = vector.shape_cast %38 : vector<16xf32> to vector<16x1xf32>
      %cst_21 = arith.constant 3.125000e-02 : f32
      %40 = vector.broadcast %cst_21 : f32 to vector<16x1xf32>
      %41 = arith.mulf %39, %40 : vector<16x1xf32>
      %cst_22 = arith.constant 9.99999997E-7 : f32
      %42 = vector.broadcast %cst_22 : f32 to vector<16x1xf32>
      %43 = arith.addf %41, %42 : vector<16x1xf32>
      %44 = math.rsqrt %43 : vector<16x1xf32>
      %45 = vector.broadcast %44 : vector<16x1xf32> to vector<16x128xf32>
      %46 = arith.mulf %32, %45 : vector<16x128xf32>
      %47 = arith.truncf %46 : vector<16x128xf32> to vector<16x128xbf16>
      %c0_23 = arith.constant 0 : index
      %c0_24 = arith.constant 0 : index
      %48 = vector.load %arg6[%c0_23, %c0_24] : memref<128x128xbf16, #tpu.memory_space<vmem>>, vector<128x128xbf16>
      %cst_25 = arith.constant dense<0.000000e+00> : vector<16x128xf32>
      %49 = tpu.matmul %47, %48, %cst_25 {dimension_numbers = #tpu.dot_dimension_numbers<[1], [0], [0], [1], [0, 0, 1, 1], [], []>} : vector<16x128xbf16>, vector<128x128xbf16>, vector<16x128xf32> -> vector<16x128xf32>
      %c0_26 = arith.constant 0 : index
      %c0_27 = arith.constant 0 : index
      %50 = vector.load %arg7[%c0_26, %c0_27] : memref<16x128xf32, #tpu.memory_space<vmem>>, vector<16x128xf32>
      tpu.vector_store %arg7[%c0_26, %c0_27], %49 {strides = array<i32>} : memref<16x128xf32, #tpu.memory_space<vmem>>, vector<16x128xf32>,
    } else {
    }
    return
  }
  func.func @transform_0(%arg0: i32, %arg1: i32) -> (i32, i32) {
    %c0_i32 = arith.constant 0 : i32
    %c0_i32_0 = arith.constant 0 : i32
    return %arg0, %c0_i32 : i32, i32
  }
  func.func @transform_1(%arg0: i32, %arg1: i32) -> (i32, i32, i32) {
    %c0_i32 = arith.constant 0 : i32
    %c0_i32_0 = arith.constant 0 : i32
    %c0_i32_1 = arith.constant 0 : i32
    return %arg1, %c0_i32, %c0_i32_0 : i32, i32, i32
  }
  func.func @transform_2(%arg0: i32, %arg1: i32) -> (i32, i32, i32) {
    %c0_i32 = arith.constant 0 : i32
    %c0_i32_0 = arith.constant 0 : i32
    %c0_i32_1 = arith.constant 0 : i32
    return %arg1, %c0_i32, %c0_i32_0 : i32, i32, i32
  }
  func.func @transform_3(%arg0: i32, %arg1: i32) -> (i32, i32, i32) {
    %c0_i32 = arith.constant 0 : i32
    %c0_i32_0 = arith.constant 0 : i32
    %c0_i32_1 = arith.constant 0 : i32
    return %arg1, %c0_i32, %c0_i32_0 : i32, i32, i32
  }
  func.func @transform_4(%arg0: i32, %arg1: i32) -> (i32, i32) {
    %c0_i32 = arith.constant 0 : i32
    %c0_i32_0 = arith.constant 0 : i32
    %c0_i32_1 = arith.constant 0 : i32
    return %c0_i32, %c0_i32_0 : i32, i32
  }
  func.func @transform_5(%arg0: i32, %arg1: i32) -> (i32, i32) {
    %c0_i32 = arith.constant 0 : i32
    %c0_i32_0 = arith.constant 0 : i32
    return %arg0, %c0_i32 : i32, i32
  }
}

</mosaic_0001>

<bundles_post_ra>
// kernel: tpu_custom_call.1
= control target key start
LH: loop header
LB: loop body
LE: loop exit
PB: predicated region body
PF: predicated region fallthrough
CT: control target
= control target key end

     0   :  { %s1988_s0 = inlined_call_operand.hbm [shape: f32[16,128], index: 0, kind: input, shape index: {}]   ;;  %s1989_s1 = inlined_call_operand.hbm [shape: bf16[2,128,128], index: 1, kind: input, shape index: {}]   ;;  %s1990_s2 = inlined_call_operand.hbm [shape: bf16[2,128,128], index: 2, kind: input, shape index: {}]   ;;  %s1991_s3 = inlined_call_operand.hbm [shape: bf16[2,128,128], index: 3, kind: input, shape index: {}]   ;;  %s1992_s4 = inlined_call_operand.hbm [shape: bf16[128,128], index: 4, kind: input, shape index: {}]   ;;  %s1993_s5 = inlined_call_operand.hbm [shape: f32[16,128], index: 5, kind: output, shape index: {}]  }
   0x1   :  { %2011 = sst [smem:[#allocation20_spill]] %s1989_s1 }
   0x2   :  { %2012 = sst [smem:[#allocation21_spill]] %s1992_s4 }
   0x3   :  { %10 = vsyncpa [#allocation4], 0 }
   0x4   :  { %11 = vsyncpa [#allocation7], 0 }
   0x5   :  { %13 = vsyncpa [#allocation7 + $0x1], 0 }
   0x6   :  { %14 = vsyncpa [#allocation10], 0 }
   0x7   :  { %16 = vsyncpa [#allocation10 + $0x1], 0 }
   0x8   :  { %17 = vsyncpa [#allocation5], 0  ;;  %s1605_s18 = smov 0   ;;  %s1607_s19 = smov 0  }
   0x9   :  { %s1609_s20 = smov 0   ;;  %s1611_s21 = smov 0  }
   0xa   :  { %s1613_s22 = smov 0   ;;  %s1615_s23 = smov 0  }
   0xb LB: > { %2013 = sst [smem:[#allocation18_spill]] %s1553_s22  ;;  %s1634_s24 = sadd.s32 4294967295, %s1557_s23   ;;  %s1557_s23 = sphi %s1615_s23, %s23_s23   ;;  %s1553_s22 = sphi %s1613_s22, %s2039_s22   ;;  %s1549_s21 = sphi %s1611_s21, %s2038_s21   ;;  %s1545_s20 = sphi %s1609_s20, %s2042_s20   ;;  %s1541_s19 = sphi %s1607_s19, %s2041_s19   ;;  %s1537_s18 = sphi %s1605_s18, %s2040_s18  }
   0xc   : > { %p75_p0 = scmp.ne.s32.totalorder %s1545_s20, %s1541_s19  ;;  %p76_p1 = scmp.eq.s32.totalorder %s1557_s23, 0 }
   0xd   : > { %p81_p2 = scmp.ne.s32.totalorder %s1541_s19, %s1537_s18  ;;  %p1994_p3 = scmp.eq.s32.totalorder %s1634_s24, 0 }
   0xe   : > { %p990_p4 = scmp.ge.s32.totalorder %s1557_s23, 1  ;;  %p1642_p5 = por %p76_p1, %p75_p0 }
   0xf   : > { %p191_p6 = scmp.lt.s32.totalorder %s1557_s23, 3  ;;  %p1649_p7 = por %p1994_p3, %p81_p2 }
  0x10   : > { %s2014_s25 = scalar_select %p1642_p5, 1, 0 }
  0x11   : > { %s2015_s26 = scalar_select %p1649_p7, 1, 0 }
  0x12   : > { %p1653_p8 = pnand %p990_p4, %p191_p6  ;;  %s1559_s28 = smov [#allocation11]  }
  0x13   : > { %s219_s29 = sshll.u32 %s1559_s28, 4  ;;  %s68_s6 = sadd.s32 1, %s1545_s20  ;;  %s220_s29 = int_to_ptr.vmem [resolvable:$true] %s219_s29 }
  0x14   : > { %s2016_s27 = scalar_select %p1653_p8, 1, 0 }
  0x15   : > { %p1186_p9 = pneg %p1653_p8  ;;  %s32_s7 = sadd.s32 1, %s1553_s22 }
  0x16   : > { %s2018_s4 = sld [smem:[#allocation21_spill]] }
  0x17   : > { %p1661_p10 = pnand %p1186_p9, %p1994_p3 }
  0x19   : > { %s2017_s30 = scalar_select %p1661_p10, 1, 0 }
  0x1a   : > { %p2002_p12 = pneg %p1661_p10 }
  0x1c   : > { %s1319_s10 = scalar_lea.hbm %s2018_s4, 1024 }
  0x1d   : > { %p1320_p11 = scmp.ne.s32.totalorder %s2018_s4, %s1319_s10  ;;  %p1326_p1 = scmp.lt.u32.totalorder %s1319_s10, %s2018_s4 }
  0x1f   : > { %p1322_p13 = pnand %p2002_p12, %p1320_p11 }
  0x21   : > { %p1323_p0 = pneg %p1322_p13 }
  0x23   : > { %p1328_p2 = pnand %p1326_p1, %p1323_p0 }
  0x25   : > { %1331 = shalt.err (!%p1328_p2)
}
  0x26   : > { %s1332_s15 = scalar_lea.vmem %s220_s29, 1024  ;;  %p1340_p3 = scmp.lt.s32.totalorder %s220_s29, %s220_s29 }
  0x27   : > { %p1333_p4 = scmp.ne.s32.totalorder %s220_s29, %s1332_s15  ;;  %p1341_p7 = scmp.lt.s32.totalorder %s1332_s15, %s1332_s15 }
  0x29   : > { %p1335_p6 = pnand %p1333_p4, %p2002_p12  ;;  %p1342_p8 = por %p1341_p7, %p1340_p3 }
  0x2b   : > { %p1336_p9 = pneg %p1335_p6 }
  0x2d   : > { %p1343_p5 = pnand %p1342_p8, %p1336_p9 }
  0x2f   : > { %1346 = shalt.err (!%p1343_p5)
}
  0x30   : > { %s1997_s16 = smov 64   ;;  %s1999_s17 = smov 4  }
  0x31   : > { %1192 = dma.hbm_to_vmem [thread:$0]  (!%p1661_p10), %s2018_s4, 1024, %s220_s29, [#allocation10], %s1997_s16, %s1997_s16, %s1999_s17  }
  0x32   : > { %p33_p3 = scmp.ge.s32.totalorder %s32_s7, 2  ;;  %p1205_p5 = scmp.lt.s32.totalorder %s1557_s23, 2 }
  0x33   : > { %s2001_s8 = sand.u32 1, %s1557_s23   ;;  %s235_s9 = sand.u32 1, %s1545_s20  }
  0x34   : > { %s2044_s7 = smov (%p33_p3, %s32_s7), 0  ;;  %s1697_s10 = sshll.u32 %s235_s9, 6 }
  0x35   : > { %2019 = sst [smem:[#allocation19_spill]] %s2044_s7  ;;  %s65_s11 = ssub.s32 %s1553_s22, %s2044_s7 }
  0x36   : > { %p66_p7 = scmp.eq.s32.totalorder %s65_s11, 0  ;;  %s1702_s12 = sshll.u32 %s1553_s22, 10 }
  0x37   : > { %s2020_s1 = sld [smem:[#allocation20_spill]]  ;;  %s237_s15 = scalar_lea.vmem [#allocation6], %s1697_s10 }
  0x38   : > { %s244_s18 = sshll.u32 %s237_s15, 4  ;;  %p2021_p8 = scmp.ne.s32.totalorder %s2014_s25, 0  ;;  %s1716_s18 = int_to_ptr.vmem [resolvable:$true] %s244_s18 }
  0x39   : > { %s1714_s28 = scalar_select %p66_p7, %s1545_s20, %s68_s6  }
  0x3a   : > { %p1722_p11 = pnand %p1205_p5, %p2021_p8  ;;  %s1728_s11 = scalar_lea.sflag [#allocation7], %s2001_s8 }
  0x3c   : > { %s2022_s9 = scalar_select %p1722_p11, 1, 0 }
  0x3d   : > { %s1708_s29 = scalar_lea.hbm %s2020_s1, %s1702_s12  ;;  %p1734_p0 = pneg %p1722_p11 }
  0x3e   : > { %s1347_s13 = scalar_lea.hbm %s1708_s29, 1024  ;;  %s1352_s15 = scalar_lea.hbm %s2020_s1, 2048 }
  0x3f   : > { %p1348_p13 = scmp.ne.s32.totalorder %s1708_s29, %s1347_s13  ;;  %p1353_p4 = scmp.lt.u32.totalorder %s1708_s29, %s2020_s1 }
  0x40   : > { %s2023_s14 = scalar_select %p1734_p0, 1, 0 }
  0x41   : > { %p1350_p1 = pnand %p1734_p0, %p1348_p13  ;;  %p1354_p6 = scmp.lt.u32.totalorder %s1352_s15, %s1347_s13 }
  0x42   : > { %p1356_p3 = scmp.lt.u32.totalorder %s1347_s13, %s1708_s29 }
  0x43   : > { %p1351_p2 = pneg %p1350_p1  ;;  %p1355_p9 = por %p1354_p6, %p1353_p4 }
  0x45   : > { %p1357_p5 = por %p1356_p3, %p1355_p9 }
  0x47   : > { %p1358_p7 = pnand %p1357_p5, %p1351_p2 }
  0x49   : > { %1361 = shalt.err (!%p1358_p7)
}
  0x4a   : > { %s1362_s8 = scalar_lea.vmem %s1716_s18, 1024  ;;  %s1562_s25 = smov [#allocation6]  }
  0x4b   : > { %p1363_p8 = scmp.ne.s32.totalorder %s1716_s18, %s1362_s8  ;;  %s1367_s6 = sshll.u32 %s1562_s25, 4  ;;  %s1368_s6 = int_to_ptr.vmem [resolvable:$false] %s1367_s6 }
  0x4c   : > { %s1369_s16 = scalar_lea.vmem %s1368_s6, 2048  ;;  %p1370_p12 = scmp.lt.s32.totalorder %s1716_s18, %s1368_s6 }
  0x4d   : > { %p1365_p13 = pnand %p1363_p8, %p1734_p0  ;;  %p1371_p10 = scmp.lt.s32.totalorder %s1369_s16, %s1362_s8 }
  0x4f   : > { %p1366_p1 = pneg %p1365_p13  ;;  %p1372_p4 = por %p1371_p10, %p1370_p12 }
  0x51   : > { %p1373_p6 = pnand %p1372_p4, %p1366_p1 }
  0x53   : > { %1376 = shalt.err (!%p1373_p6)
}
  0x54   : > { %s2024_s17 = smov 4   ;;  %s2025_s13 = smov 64  }
  0x55   : > { %1196 = dma.hbm_to_vmem [thread:$0]  (!%p1722_p11), %s1708_s29, 1024, %s1716_s18, %s1728_s11, %s2025_s13, %s2025_s13, %s2024_s17  }
  0x56   : > { %s1563_s15 = smov [#allocation3]   ;;  %s1377_s8 = scalar_lea.hbm %s1988_s0, 256 }
  0x57   : > { %s206_s1 = sshll.u32 %s1563_s15, 4  ;;  %p1378_p10 = scmp.ne.s32.totalorder %s1988_s0, %s1377_s8  ;;  %s207_s1 = int_to_ptr.vmem [resolvable:$true] %s206_s1 }
  0x58   : > { %p2026_p12 = scmp.ne.s32.totalorder %s2017_s30, 0  ;;  %p1384_p5 = scmp.lt.u32.totalorder %s1377_s8, %s1988_s0 }
  0x5a   : > { %p2027_p2 = pneg %p2026_p12 }
  0x5c   : > { %p1380_p9 = pnand %p1378_p10, %p2027_p2 }
  0x5e   : > { %p1381_p3 = pneg %p1380_p9 }
  0x60   : > { %p1386_p7 = pnand %p1384_p5, %p1381_p3 }
  0x62   : > { %1389 = shalt.err (!%p1386_p7)
}
  0x63   : > { %s1390_s29 = scalar_lea.vmem %s207_s1, 256  ;;  %p2028_p13 = pmov %p2027_p2 }
  0x64   : > { %p1391_p8 = scmp.ne.s32.totalorder %s207_s1, %s1390_s29  ;;  %p1398_p6 = scmp.lt.s32.totalorder %s207_s1, %s207_s1 }
  0x65   : > { %p1399_p11 = scmp.lt.s32.totalorder %s1390_s29, %s1390_s29 }
  0x66   : > { %p1393_p1 = pnand %p1391_p8, %p2028_p13 }
  0x67   : > { %p1400_p0 = por %p1399_p11, %p1398_p6 }
  0x68   : > { %p1394_p4 = pneg %p1393_p1 }
  0x6a   : > { %p1401_p2 = pnand %p1400_p0, %p1394_p4 }
  0x6c   : > { %1404 = shalt.err (!%p1401_p2)
}
  0x6d   : > { %s1564_s4 = smov 128   ;;  %s1565_s22 = smov 8  }
  0x6e   : > { %1189 = dma.hbm_to_vmem [thread:$0]  (!%p2026_p12), %s1988_s0, 256, %s207_s1, [#allocation4], %s1564_s4, %s1564_s4, %s1565_s22  }
  0x6f   : > { %s1785_s8 = scalar_lea.hbm %s1990_s2, %s1702_s12  ;;  %s258_s6 = scalar_lea.vmem [#allocation8], %s1697_s10 }
  0x70   : > { %s265_s16 = sshll.u32 %s258_s6, 4  ;;  %s1405_s29 = scalar_lea.hbm %s1785_s8, 1024  ;;  %s1788_s16 = int_to_ptr.vmem [resolvable:$true] %s265_s16 }
  0x71   : > { %p1406_p11 = scmp.ne.s32.totalorder %s1785_s8, %s1405_s29  ;;  %p2029_p0 = scmp.ne.s32.totalorder %s2023_s14, 0 }
  0x72   : > { %s1410_s4 = scalar_lea.hbm %s1990_s2, 2048  ;;  %p1411_p12 = scmp.lt.u32.totalorder %s1785_s8, %s1990_s2 }
  0x73   : > { %p1408_p10 = pnand %p1406_p11, %p2029_p0  ;;  %p1412_p3 = scmp.lt.u32.totalorder %s1410_s4, %s1405_s29 }
  0x74   : > { %p1414_p7 = scmp.lt.u32.totalorder %s1405_s29, %s1785_s8 }
  0x75   : > { %p1409_p9 = pneg %p1408_p10  ;;  %p1413_p5 = por %p1412_p3, %p1411_p12 }
  0x77   : > { %p1415_p8 = por %p1414_p7, %p1413_p5 }
  0x79   : > { %p1416_p13 = pnand %p1415_p8, %p1409_p9 }
  0x7b   : > { %1419 = shalt.err (!%p1416_p13)
}
  0x7c   : > { %s1420_s18 = scalar_lea.vmem %s1788_s16, 1024  ;;  %s1566_s15 = smov [#allocation8]  }
  0x7d   : > { %p1421_p1 = scmp.ne.s32.totalorder %s1788_s16, %s1420_s18  ;;  %s1425_s25 = sshll.u32 %s1566_s15, 4  ;;  %s1426_s25 = int_to_ptr.vmem [resolvable:$false] %s1425_s25 }
  0x7e   : > { %s1427_s6 = scalar_lea.vmem %s1426_s25, 2048  ;;  %p1428_p2 = scmp.lt.s32.totalorder %s1788_s16, %s1426_s25 }
  0x7f   : > { %p1423_p4 = pnand %p1421_p1, %p2029_p0  ;;  %p1429_p11 = scmp.lt.s32.totalorder %s1427_s6, %s1420_s18 }
  0x81   : > { %p1424_p6 = pneg %p1423_p4  ;;  %p1430_p10 = por %p1429_p11, %p1428_p2 }
  0x83   : > { %p1431_p12 = pnand %p1430_p10, %p1424_p6 }
  0x85   : > { %1434 = shalt.err (!%p1431_p12)
}
  0x86   : > { %p2030_p9 = scmp.ne.s32.totalorder %s2022_s9, 0  ;;  %s1819_s1 = scalar_lea.hbm %s1991_s3, %s1702_s12 }
  0x87   : > { %s279_s4 = scalar_lea.vmem [#allocation9], %s1697_s10  ;;  %s2031_s7 = sand.u32 1, %s1557_s23  }
  0x88   : > { %1199 = dma.hbm_to_vmem [thread:$0]  (!%p2030_p9), %s1785_s8, 1024, %s1788_s16, %s1728_s11, %s2025_s13, %s2025_s13, %s2024_s17  }
  0x89   : > { %s286_s22 = sshll.u32 %s279_s4, 4  ;;  %s1826_s18 = scalar_lea.sflag [#allocation10], %s2031_s7  ;;  %s1822_s22 = int_to_ptr.vmem [resolvable:$true] %s286_s22 }
  0x8a   : > { %s1435_s15 = scalar_lea.hbm %s1819_s1, 1024  ;;  %s1440_s12 = scalar_lea.hbm %s1991_s3, 2048 }
  0x8b   : > { %p1436_p3 = scmp.ne.s32.totalorder %s1819_s1, %s1435_s15  ;;  %p1441_p8 = scmp.lt.u32.totalorder %s1819_s1, %s1991_s3 }
  0x8c   : > { %p1442_p13 = scmp.lt.u32.totalorder %s1440_s12, %s1435_s15  ;;  %p1444_p4 = scmp.lt.u32.totalorder %s1435_s15, %s1819_s1 }
  0x8d   : > { %p1438_p5 = pnand %p1436_p3, %p2029_p0 }
  0x8e   : > { %p1443_p1 = por %p1442_p13, %p1441_p8 }
  0x8f   : > { %p1439_p7 = pneg %p1438_p5 }
  0x90   : > { %p1445_p6 = por %p1444_p4, %p1443_p1 }
  0x92   : > { %p1446_p2 = pnand %p1445_p6, %p1439_p7 }
  0x94   : > { %1449 = shalt.err (!%p1446_p2)
}
  0x95   : > { %s1450_s10 = scalar_lea.vmem %s1822_s22, 1024  ;;  %s1567_s6 = smov [#allocation9]  }
  0x96   : > { %p1451_p11 = scmp.ne.s32.totalorder %s1822_s22, %s1450_s10  ;;  %s1455_s29 = sshll.u32 %s1567_s6, 4  ;;  %s1456_s29 = int_to_ptr.vmem [resolvable:$false] %s1455_s29 }
  0x97   : > { %s1457_s30 = scalar_lea.vmem %s1456_s29, 2048  ;;  %p1458_p3 = scmp.lt.s32.totalorder %s1822_s22, %s1456_s29 }
  0x98   : > { %p1453_p10 = pnand %p1451_p11, %p2029_p0  ;;  %p1459_p5 = scmp.lt.s32.totalorder %s1457_s30, %s1450_s10 }
  0x9a   : > { %p1454_p12 = pneg %p1453_p10  ;;  %p1460_p8 = por %p1459_p5, %p1458_p3 }
  0x9c   : > { %p1461_p13 = pnand %p1460_p8, %p1454_p12 }
  0x9e   : > { %1464 = shalt.err (!%p1461_p13)
}
  0x9f   : > { %1202 = dma.hbm_to_vmem [thread:$0]  (!%p2030_p9), %s1819_s1, 1024, %s1822_s22, %s1826_s18, %s2025_s13, %s2025_s13, %s2024_s17  }
  0xa0   : > { %p2032_p0 = scmp.ne.s32.totalorder %s2016_s27, 0 }
  0xa1   : > { %p2033_p7 = scmp.eq.s32.totalorder (!%p2032_p0), %s1634_s24, 0 }
  0xa2   : > { %298 = sbr.rel (%p2032_p0) target bundleno = 1226 (0x4ca), region = 40 }
  0xa9   : > { %1516 = dma.done.wait (%p2033_p7), [#allocation4], 256   ;;  %p2034_p1 = pmov %p2033_p7 }
  0xaa   : > { %s304_s9 = sand.u32 1, %s1634_s24   ;;  %s306_s14 = sand.u32 1, %s1541_s19  }
  0xab   : > { %1518 = vsyncadd (%p2034_p1), [#allocation4], 4294967040  ;;  %s1005_s4 = sshll.u32 %s306_s14, 6  ;;  %s305_s7 = scalar_lea.sflag [#allocation7], %s304_s9 }
  0xac   : > { %s1861_s15 = scalar_lea.vmem [#allocation6], %s1005_s4  ;;  %p2035_p4 = scmp.ne.s32.totalorder %s2015_s26, 0 }
  0xae   : > { %1520 = dma.done.wait (%p2035_p4), %s305_s7, 2048  }
  0xaf   : > { %1522 = vsyncadd (%p2035_p4), %s305_s7, 4294965248  ;;  %s1867_s27 = scalar_lea.vmem [#allocation8], %s1005_s4  ;;  %s323_s17 = scalar_lea.sflag [#allocation10], %s304_s9 }
  0xb0   : > { %s1869_s13 = scalar_lea.vmem [#allocation9], %s1005_s4 }
  0xb1   : > { %1524 = dma.done.wait (%p2035_p4), %s323_s17, 1024  }
  0xb2   : > { %1526 = vsyncadd (%p2035_p4), %s323_s17, 4294966272  ;;  %p2036_p9 = pmov %p2034_p1 }
  0xb3   : > { %p2037_p6 = pmov %p2034_p1 }
  0xb4   : > { %1528 = dma.done.wait (%p2036_p9), [#allocation10], 1024  }
  0xb5   : > { %1530 = vsyncadd (%p2037_p6), [#allocation10], 4294966272  ;;  %p1009_p2 = scmp.ne.s32.totalorder %s1549_s21, 0 }
  0xb6   : > { %v369_v0 = vld [vmem:[#allocation3] sm:$0xff] (!%p1009_p2)  ;;  %v370_v1 = vld [vmem:[#allocation3 + $0x8] sm:$0xff] (!%p1009_p2) }
  0xb7   : > { %368 = sbr.rel (%p1009_p2) target bundleno = 190 (0xbe), region = 64  ;;  %371 = vst [vmem:[#allocation2] sm:$0xff] (!%p1009_p2), %v369_v0  ;;  %372 = vst [vmem:[#allocation2 + $0x8] sm:$0xff] (!%p1009_p2), %v370_v1 }
  0xbe PF: > { %v1880_v2 = vld [vmem:[#allocation2] sm:$0xff]  ;;  %v1882_v3 = vld [vmem:[#allocation2 + $0x8] sm:$0xff]  ;;  %v1568_v5 = vmov 0.0   ;;  %v1275_v11 = vld [vmem:[%s1861_s15 + $0x10] sm:$0xff]   ;;  %vm1569_vm0 = vmmov 0   ;;  %p1036_p11 = scmp.ne.s32.totalorder %s1549_s21, 1 }
  0xbf   : > { %v375_v4 = vmul.f32 %v1880_v2, %v1880_v2  ;;  %1088 = vmatprep.subr.bf16.mxu0 %v1568_v5  ;;  %1108 = vmatprep.subr.bf16.mxu1 %v1568_v5  ;;  %v1271_v6 = vld [vmem:[%s1861_s15] sm:$0xff]   ;;  %v376_v8 = vmul.f32 %v1882_v3, %v1882_v3  ;;  %v1273_v9 = vld [vmem:[%s1861_s15 + $0x8] sm:$0xff]   ;;  %v1276_v12 = vld [vmem:[%s1867_s27 + $0x10] sm:$0xff]   ;;  %vm1571_vm1 = vmmov (!%p1036_p11), 0  }
  0xc0   : > { %v1272_v7 = vld [vmem:[%s1867_s27] sm:$0xff]   ;;  %1089 = vmatpush3.bf16.msra.mxu0 %v1271_v6  ;;  %v1274_v10 = vld [vmem:[%s1867_s27 + $0x8] sm:$0xff]   ;;  %v1277_v13 = vld [vmem:[%s1861_s15 + $0x18] sm:$0xff]   ;;  %1104 = vmatprep.mubr.msk.bf16.mxu0 %vm1569_vm0, %v1568_v5 }
  0xc1   : > { %377 = vadd.xlane.f32.xlu0 %v375_v4  ;;  %1109 = vmatpush3.bf16.msra.mxu1 %v1272_v7  ;;  %v1278_v14 = vld [vmem:[%s1867_s27 + $0x18] sm:$0xff]   ;;  %v1279_v15 = vld [vmem:[%s1861_s15 + $0x20] sm:$0xff]   ;;  %v1281_v17 = vld [vmem:[%s1861_s15 + $0x28] sm:$0xff]  }
  0xc2   : > { %1090 = vmatprep.subr.bf16.mxu0 %v1568_v5  ;;  %1110 = vmatprep.subr.bf16.mxu1 %v1568_v5  ;;  %v1280_v16 = vld [vmem:[%s1867_s27 + $0x20] sm:$0xff]   ;;  %v1282_v18 = vld [vmem:[%s1867_s27 + $0x28] sm:$0xff]   ;;  %v1283_v19 = vld [vmem:[%s1861_s15 + $0x30] sm:$0xff]  }
  0xc3   : > { %1124 = vmatprep.mubr.msk.bf16.mxu1 %vm1569_vm0, %v1568_v5  ;;  %v1284_v20 = vld [vmem:[%s1867_s27 + $0x30] sm:$0xff]   ;;  %v1285_v21 = vld [vmem:[%s1861_s15 + $0x38] sm:$0xff]   ;;  %v1287_v34 = vld [vmem:[%s1869_s13] sm:$0xff]  }
  0xc4   : > { %1091 = vmatpush3.bf16.msra.mxu0 %v1273_v9  ;;  %v1286_v22 = vld [vmem:[%s1867_s27 + $0x38] sm:$0xff]   ;;  %v1288_v35 = vld [vmem:[%s1869_s13 + $0x8] sm:$0xff]   ;;  %v1289_v36 = vld [vmem:[%s1869_s13 + $0x10] sm:$0xff]   ;;  %v1570_v9 = vmov (!%p1036_p11), 0.0  }
  0xc5   : > { %379 = vadd.xlane.f32.xlu0 %v376_v8  ;;  %1111 = vmatpush3.bf16.msra.mxu1 %v1274_v10  ;;  %v1290_v37 = vld [vmem:[%s1869_s13 + $0x18] sm:$0xff]   ;;  %v1291_v38 = vld [vmem:[%s1869_s13 + $0x20] sm:$0xff]   ;;  %v1292_v39 = vld [vmem:[%s1869_s13 + $0x28] sm:$0xff]  }
  0xc6   : > { %1092 = vmatprep.subr.bf16.mxu0 %v1568_v5  ;;  %1112 = vmatprep.subr.bf16.mxu1 %v1568_v5  ;;  %v1293_v40 = vld [vmem:[%s1869_s13 + $0x30] sm:$0xff]   ;;  %v1294_v41 = vld [vmem:[%s1869_s13 + $0x38] sm:$0xff]   ;;  %v1307_v8 = vld [vmem:[#allocation11] sm:$0xff] (!%p1036_p11)  }
  0xc7   : > { %v1308_v10 = vld [vmem:[#allocation11 + $0x8] sm:$0xff] (!%p1036_p11)  }
  0xc8   : > { %1093 = vmatpush3.bf16.msra.mxu0 %v1275_v11 }
  0xc9   : > { %1113 = vmatpush3.bf16.msra.mxu1 %v1276_v12  ;;  %1094 = vmatprep.subr.bf16.mxu0 %v1568_v5  ;;  %v1311_v12 = vld [vmem:[#allocation11 + $0x20] sm:$0xff] (!%p1036_p11)  }
  0xca   : > { %1114 = vmatprep.subr.bf16.mxu1 %v1568_v5 }
  0xcc   : > { %1095 = vmatpush3.bf16.msra.mxu0 %v1277_v13  ;;  %v1312_v13 = vld [vmem:[#allocation11 + $0x28] sm:$0xff] (!%p1036_p11)  }
  0xcd   : > { %1115 = vmatpush3.bf16.msra.mxu1 %v1278_v14  ;;  %1096 = vmatprep.subr.bf16.mxu0 %v1568_v5  ;;  %v1313_v14 = vld [vmem:[#allocation11 + $0x30] sm:$0xff] (!%p1036_p11)  }
  0xce   : > { %1116 = vmatprep.subr.bf16.mxu1 %v1568_v5 }
  0xd0   : > { %1097 = vmatpush3.bf16.msra.mxu0 %v1279_v15  ;;  %v1314_v15 = vld [vmem:[#allocation11 + $0x38] sm:$0xff] (!%p1036_p11)  }
  0xd1   : > { %1117 = vmatpush3.bf16.msra.mxu1 %v1280_v16  ;;  %1098 = vmatprep.subr.bf16.mxu0 %v1568_v5 }
  0xd2   : > { %1118 = vmatprep.subr.bf16.mxu1 %v1568_v5 }
  0xd4   : > { %1099 = vmatpush3.bf16.msra.mxu0 %v1281_v17 }
  0xd5   : > { %1119 = vmatpush3.bf16.msra.mxu1 %v1282_v18  ;;  %1100 = vmatprep.subr.bf16.mxu0 %v1568_v5 }
  0xd6   : > { %1120 = vmatprep.subr.bf16.mxu1 %v1568_v5 }
  0xd8   : > { %1101 = vmatpush3.bf16.msra.mxu0 %v1283_v19 }
  0xd9   : > { %1121 = vmatpush3.bf16.msra.mxu1 %v1284_v20  ;;  %1102 = vmatprep.subr.bf16.mxu0 %v1568_v5 }
  0xda   : > { %1122 = vmatprep.subr.bf16.mxu1 %v1568_v5 }
  0xdc   : > { %1103 = vmatpush3.bf16.msra.mxu0 %v1285_v21 }
  0xdd   : > { %1123 = vmatpush3.bf16.msra.mxu1 %v1286_v22  ;;  %1128 = vmatprep.subr.bf16.mxu0 %v1568_v5 }
 0x14e   : > { %v378_v23 = vpop.xlane.xlu0 %377 }
 0x14f   : > { %v381_v24 = vmul.f32 0.03125, %v378_v23 }
 0x151   : > { %v383_v25 = vadd.f32 1e-06, %v381_v24 }
 0x152   : > { %v380_v26 = vpop.xlane.xlu0 %379 }
 0x153   : > { %v382_v27 = vmul.f32 0.03125, %v380_v26  ;;  %1295 = vrsqrt.f32 %v383_v25 }
 0x155   : > { %v384_v28 = vadd.f32 1e-06, %v382_v27 }
 0x157   : > { %1297 = vrsqrt.f32 %v384_v28 }
 0x15d   : > { %v1296_v29 = vpop.eup %1295 }
 0x15e   : > { %v387_v31 = vmul.f32 %v1296_v29, %v1880_v2 }
 0x161   : > { %v1298_v30 = vpop.eup %1297 }
 0x162   : > { %v388_v32 = vmul.f32 %v1298_v30, %v1882_v3 }
 0x164   : > { %v389_v33 = vpack.c.bf16 %v388_v32, %v387_v31 }
 0x166   : > { %1105 = vmatmul.mubr.bf16.vlgmr.msra.gmra.mrb[0].mxu0 %v389_v33  ;;  %1125 = vmatmul.mubr.bf16.vlgmr.msra.gmra.mrb[0].mxu1 %v389_v33 }
 0x167   : > { %1144 = vmatprep.mubr.msk.bf16.mxu0 %vm1569_vm0, %v1568_v5  ;;  %1129 = vmatpush3.bf16.msra.mxu0 %v1287_v34 }
 0x168   : > { %1130 = vmatprep.subr.bf16.mxu0 %v1568_v5 }
 0x16b   : > { %1131 = vmatpush3.bf16.msra.mxu0 %v1288_v35 }
 0x16c   : > { %1132 = vmatprep.subr.bf16.mxu0 %v1568_v5 }
 0x16f   : > { %1133 = vmatpush3.bf16.msra.mxu0 %v1289_v36 }
 0x170   : > { %1134 = vmatprep.subr.bf16.mxu0 %v1568_v5 }
 0x173   : > { %1135 = vmatpush3.bf16.msra.mxu0 %v1290_v37 }
 0x174   : > { %1136 = vmatprep.subr.bf16.mxu0 %v1568_v5 }
 0x177   : > { %1137 = vmatpush3.bf16.msra.mxu0 %v1291_v38 }
 0x178   : > { %1138 = vmatprep.subr.bf16.mxu0 %v1568_v5 }
 0x17b   : > { %1139 = vmatpush3.bf16.msra.mxu0 %v1292_v39 }
 0x17c   : > { %1140 = vmatprep.subr.bf16.mxu0 %v1568_v5 }
 0x17f   : > { %1141 = vmatpush3.bf16.msra.mxu0 %v1293_v40 }
 0x180   : > { %1142 = vmatprep.subr.bf16.mxu0 %v1568_v5 }
 0x183   : > { %1143 = vmatpush3.bf16.msra.mxu0 %v1294_v41 }
 0x184   : > { %1148 = vmatprep.subr.bf16.mxu0 (!%p1036_p11), %v1570_v9 }
 0x239   : > { %v488_v42 = vpop.f32.mrb[0].mxu0  ;;  %v593_v43 = vpop.f32.mrb[0].mxu1 }
 0x23a   : > { %v1026_v44 = vmul.f32 -1.442695, %v488_v42  ;;  %v1106_v45 = vpop.f32.mrb[1].mxu0  ;;  %v1126_v46 = vpop.f32.mrb[1].mxu1 }
 0x23b   : > { %v491_v47 = vpop.f32.mrb[2].mxu0  ;;  %v596_v48 = vpop.f32.mrb[2].mxu1 }
 0x23c   : > { %1299 = vpow2.f32 %v1026_v44  ;;  %v1027_v49 = vmul.f32 -1.442695, %v491_v47  ;;  %v1107_v50 = vpop.f32.mrb[3].mxu0  ;;  %v1127_v51 = vpop.f32.mrb[3].mxu1 }
 0x23e   : > { %1301 = vpow2.f32 %v1027_v49 }
 0x246   : > { %v1300_v52 = vpop.eup %1299 }
 0x247   : > { %v606_v53 = vadd.f32 1.0, %v1300_v52 }
 0x248   : > { %v1302_v54 = vpop.eup %1301 }
 0x249   : > { %1303 = vrcp.f32 %v606_v53  ;;  %v607_v55 = vadd.f32 1.0, %v1302_v54 }
 0x24b   : > { %1305 = vrcp.f32 %v607_v55 }
 0x253   : > { %v1304_v56 = vpop.eup %1303 }
 0x254   : > { %v612_v57 = vmul.f32 %v1304_v56, %v488_v42 }
 0x255   : > { %v1306_v58 = vpop.eup %1305 }
 0x256   : > { %v614_v59 = vmul.f32 %v612_v57, %v593_v43  ;;  %v613_v60 = vmul.f32 %v1306_v58, %v491_v47 }
 0x258   : > { %v615_v61 = vmul.f32 %v613_v60, %v596_v48 }
 0x25a   : > { %v616_v62 = vpack.c.bf16 %v615_v61, %v614_v59 }
 0x25c   : > { %1145 = vmatmul.mubr.bf16.vlgmr.msra.gmra.mrb[4].mxu0 %v616_v62 }
 0x25d   : > { %1149 = vmatpush3.bf16.msra.mxu0 (!%p1036_p11), %v1307_v8  ;;  %1164 = vmatprep.mubr.msk.bf16.mxu0 (!%p1036_p11), %vm1571_vm1, %v1570_v9 }
 0x25e   : > { %1150 = vmatprep.subr.bf16.mxu0 (!%p1036_p11), %v1570_v9 }
 0x261   : > { %1151 = vmatpush3.bf16.msra.mxu0 (!%p1036_p11), %v1308_v10 }
 0x262   : > { %1152 = vmatprep.subr.bf16.mxu0 (!%p1036_p11), %v1570_v9 }
 0x32e   : > { %727 = sbr.rel (%p1036_p11) target bundleno = 1200 (0x4b0), region = 68 }
 0x32f   : > { %v715_v63 = vpop.f32.mrb[4].mxu0 }
 0x330   : > { %v716_v0 = vadd.f32 %v715_v63, %v1880_v2  ;;  %v1146_v1 = vpop.f32.mrb[5].mxu0  ;;  %v1309_v2 = vld [vmem:[#allocation11 + $0x10] sm:$0xff] (!%p1036_p11)  }
 0x331   : > { %v718_v4 = vpop.f32.mrb[6].mxu0  ;;  %1153 = vmatpush3.bf16.msra.mxu0 (!%p1036_p11), %v1309_v2 }
 0x332   : > { %722 = vst [vmem:[#allocation2] sm:$0xff] %v716_v0  ;;  %v719_v5 = vadd.f32 %v718_v4, %v1882_v3  ;;  %v1147_v6 = vpop.f32.mrb[7].mxu0  ;;  %v728_v7 = vmul.f32 (!%p1036_p11), %v716_v0, %v716_v0  ;;  %1154 = vmatprep.subr.bf16.mxu0 (!%p1036_p11), %v1570_v9  ;;  %v1310_v3 = vld [vmem:[#allocation11 + $0x18] sm:$0xff] (!%p1036_p11)  }
 0x334   : > { %723 = vst [vmem:[#allocation2 + $0x8] sm:$0xff] %v719_v5  ;;  %730 = vadd.xlane.f32.xlu0 (!%p1036_p11), %v728_v7  ;;  %v729_v11 = vmul.f32 (!%p1036_p11), %v719_v5, %v719_v5 }
 0x335   : > { %1155 = vmatpush3.bf16.msra.mxu0 %v1310_v3 }
 0x336   : > { %1156 = vmatprep.subr.bf16.mxu0 %v1570_v9 }
 0x338   : > { %732 = vadd.xlane.f32.xlu0 %v729_v11 }
 0x339   : > { %1157 = vmatpush3.bf16.msra.mxu0 %v1311_v12 }
 0x33a   : > { %1158 = vmatprep.subr.bf16.mxu0 %v1570_v9 }
 0x33d   : > { %1159 = vmatpush3.bf16.msra.mxu0 %v1312_v13 }
 0x33e   : > { %1160 = vmatprep.subr.bf16.mxu0 %v1570_v9 }
 0x341   : > { %1161 = vmatpush3.bf16.msra.mxu0 %v1313_v14 }
 0x342   : > { %1162 = vmatprep.subr.bf16.mxu0 %v1570_v9 }
 0x345   : > { %1163 = vmatpush3.bf16.msra.mxu0 %v1314_v15 }
 0x3c1   : > { %v731_v16 = vpop.xlane.xlu0 %730 }
 0x3c2   : > { %v734_v17 = vmul.f32 0.03125, %v731_v16 }
 0x3c4   : > { %v736_v18 = vadd.f32 1e-06, %v734_v17 }
 0x3c5   : > { %v733_v19 = vpop.xlane.xlu0 %732 }
 0x3c6   : > { %v735_v20 = vmul.f32 0.03125, %v733_v19  ;;  %1315 = vrsqrt.f32 %v736_v18 }
 0x3c8   : > { %v737_v21 = vadd.f32 1e-06, %v735_v20 }
 0x3ca   : > { %1317 = vrsqrt.f32 %v737_v21 }
 0x3d0   : > { %v1316_v22 = vpop.eup %1315 }
 0x3d1   : > { %v740_v24 = vmul.f32 %v1316_v22, %v716_v0 }
 0x3d4   : > { %v1318_v23 = vpop.eup %1317 }
 0x3d5   : > { %v741_v25 = vmul.f32 %v1318_v23, %v719_v5 }
 0x3d7   : > { %v742_v26 = vpack.c.bf16 %v741_v25, %v740_v24 }
 0x3d9   : > { %1165 = vmatmul.mubr.bf16.vlgmr.msra.gmra.mrb[0].mxu0 %v742_v26 }
 0x4ac   : > { %v841_v27 = vpop.f32.mrb[0].mxu0 }
 0x4ad   : > { %848 = vst [vmem:[#allocation12] sm:$0xff] %v841_v27  ;;  %v1166_v28 = vpop.f32.mrb[1].mxu0 }
 0x4ae   : > { %v844_v29 = vpop.f32.mrb[2].mxu0 }
 0x4af   : > { %849 = vst [vmem:[#allocation12 + $0x8] sm:$0xff] %v844_v29  ;;  %v1167_v30 = vpop.f32.mrb[3].mxu0 }
 0x4b0 PF: > { %p1208_p10 = scmp.eq.s32.totalorder %s1634_s24, 1  ;;  %s1572_s21 = smov [#allocation12]  }
 0x4b1   : > { %s859_s26 = sshll.u32 %s1572_s21, 4  ;;  %s860_s26 = int_to_ptr.vmem [resolvable:$true] %s859_s26 }
 0x4b2   : > { %s1465_s1 = scalar_lea.vmem %s860_s26, 256  ;;  %p1472_p8 = scmp.lt.s32.totalorder %s860_s26, %s860_s26 }
 0x4b3   : > { %p1466_p12 = scmp.ne.s32.totalorder %s860_s26, %s1465_s1  ;;  %p1473_p13 = scmp.lt.s32.totalorder %s1465_s1, %s1465_s1 }
 0x4b5   : > { %p1467_p3 = pnand %p1466_p12, %p1208_p10  ;;  %p1474_p0 = por %p1473_p13, %p1472_p8 }
 0x4b7   : > { %p1468_p5 = pneg %p1467_p3 }
 0x4b9   : > { %p1475_p7 = pnand %p1474_p0, %p1468_p5 }
 0x4bb   : > { %1478 = shalt.err (!%p1475_p7)
}
 0x4bc   : > { %s1479_s11 = scalar_lea.hbm %s1993_s5, 256 }
 0x4bd   : > { %p1480_p1 = scmp.ne.s32.totalorder %s1993_s5, %s1479_s11  ;;  %p1485_p6 = scmp.lt.u32.totalorder %s1479_s11, %s1993_s5 }
 0x4bf   : > { %p1481_p4 = pnand %p1480_p1, %p1208_p10 }
 0x4c1   : > { %p1482_p9 = pneg %p1481_p4 }
 0x4c3   : > { %p1487_p2 = pnand %p1485_p6, %p1482_p9 }
 0x4c5   : > { %1490 = shalt.err (!%p1487_p2)
}
 0x4c6   : > { %s1573_s10 = smov 128   ;;  %s1574_s6 = smov 8  }
 0x4c7   : > { %1183 = dma.vmem_to_hbm [thread:$0]  (%p1208_p10), %s860_s26, 256, %s1993_s5, [#allocation5], %s1573_s10, %s1573_s10, %s1574_s6  }
 0x4c8   : > { %1532 = dma.done.wait (%p1208_p10), [#allocation5], 256  }
 0x4c9   : > { %1534 = vsyncadd (%p1208_p10), [#allocation5], 4294967040 }
 0x4ca PF: > { %s23_s23 = sadd.s32 1, %s1557_s23   ;;  %s2038_s21 = sld [smem:[#allocation18_spill]] }
 0x4cb   : > { %p20_p11 = scmp.ge.s32.totalorder %s23_s23, 4   ;;  %s2039_s22 = sld [smem:[#allocation19_spill]] }
 0x4cc   : > { %s2040_s18 = smov %s1541_s19  ;;  %s2041_s19 = smov %s1545_s20 }
 0x4cd   : > { %s2042_s20 = smov %s1714_s28  ;;  %22 = sbr.rel (!%p20_p11) target bundleno = 11 (0xb), region = 120 }
 0x4d4   :  { %875 = vsyncpa [#allocation4], 1 }
 0x4d5   :  { %877 = vsyncpa [#allocation4 + $0x1], 1 }
 0x4d6   :  { %878 = vsyncpa [#allocation7], 1 }
 0x4d7   :  { %880 = vsyncpa [#allocation7 + $0x1], 1 }
 0x4d8   :  { %881 = vsyncpa [#allocation10], 1 }
 0x4d9   :  { %883 = vsyncpa [#allocation10 + $0x1], 1 }
 0x4da   :  { %884 = vsyncpa [#allocation5], 1 }
 0x4db   :  { %886 = vsyncpa [#allocation5 + $0x1], 1 }

</bundles_post_ra>
